<compile_context>
chip_gen: v7x
topology: tpu7x:2x2x1
jax: 0.10.0
libtpu: 0.0.40
codegen_flags: <defaults>
</compile_context>

<pallas_src>
import jax
import jax.numpy as jnp
from jax import lax
from jax.experimental import pallas as pl
from jax.experimental.pallas import tpu as pltpu


def _round_up(x, m):
    return (x + m - 1) // m * m


def _vmem_limit_bytes():
    """Generation-aware scoped-VMEM budget: ~96 MiB on 128-MiB parts, ~48 MiB on v7x."""
    cap = 128 << 20
    try:
        info = pltpu.get_tpu_info()
        cap = int(getattr(info, "vmem_capacity_bytes", cap) or cap)
    except Exception:
        pass
    return min(cap * 3 // 4, 96 << 20)


def _pick_m_tile(M, cap):
    """Lane-dense spatial tile that avoids padding (and the crop copy) whenever possible."""
    if M % 128 == 0:
        k = min(cap // 128, M // 128)
        while k > 1 and (M // 128) % k != 0:
            k -= 1
        return 128 * k, M                      # exact 128-multiple divisor of M
    if M <= cap:
        return M, M                            # single full-extent tile, no pad / no crop
    m_tile = cap
    return m_tile, _round_up(M, m_tile)        # rare: pad + mask + final crop


def _conv_tile_plan(KKCg, Cout_g, M, vmem_limit):
    """Choose (m_tile, M_pad, k_tile, KKCg_pad) so double-buffered blocks fit VMEM."""
    budget = max(int(vmem_limit * 0.6), 8 << 20)
    cap = 1024 if vmem_limit >= (96 << 20) else 512
    m_tile, M_pad = _pick_m_tile(M, cap)

    def fits(kt, mt):
        b = 2 * (kt * mt * 2 + Cout_g * kt * 2)        # bf16 patches + weights, 2 buffers
        b += 2 * (Cout_g * mt * 4 + 2 * Cout_g * 4)    # f32 y + stats partials, 2 buffers
        b += Cout_g * mt * 4                           # f32 accumulator scratch
        return b <= budget

    k_full = _round_up(KKCg, 8)                        # sublane-align the contraction dim
    k_tile = k_full
    while not fits(k_tile, m_tile):
        if k_tile > 128:                               # k-tiling (needed earlier on v7x)
            k_tile = max(128, _round_up(k_tile // 2, 128))
        elif m_tile > 128:
            m_tile = max(128, _round_up(m_tile // 2, 128))
            M_pad = _round_up(M, m_tile)
        else:
            break
    KKCg_pad = _round_up(KKCg, k_tile)
    return m_tile, M_pad, k_tile, KKCg_pad


# ----------------------------------------------------------------------------
# Kernel 1: conv2d (im2col matmul) fused with BN partial statistics.
#   grid = (G, N, num_m, num_k); k is the contraction ("arbitrary") axis.
# ----------------------------------------------------------------------------
def _make_conv_bn_kernel(M, m_tile, need_mask):
    def kernel(p_ref, w_ref, b_ref, y_ref, sum_ref, sq_ref, acc_ref):
        k = pl.program_id(3)

        @pl.when(k == 0)
        def _init():
            acc_ref[...] = jnp.zeros_like(acc_ref)

        acc_ref[...] += jnp.dot(w_ref[0], p_ref[0, 0],
                                preferred_element_type=jnp.float32)

        @pl.when(k == pl.num_programs(3) - 1)
        def _finalize():
            y = acc_ref[...] + b_ref[0]                # (Cout_g, m_tile) f32
            y_ref[0, 0] = y
            if need_mask:                              # zero padded spatial columns for stats
                m = pl.program_id(2)
                col = m * m_tile + lax.broadcasted_iota(jnp.int32, y.shape, 1)
                y = jnp.where(col < M, y, 0.0)
            sum_ref[0, 0, 0] = jnp.sum(y, axis=1, keepdims=True)
            sq_ref[0, 0, 0] = jnp.sum(y * y, axis=1, keepdims=True)

    return kernel


def conv_bn_stats_pallas(patches, w2, b2, *, m_tile, k_tile, M, vmem_limit):
    """patches: (N,G,KKCg_pad,M_pad) bf16; w2: (G,Cout_g,KKCg_pad) bf16; b2: (G,Cout_g,1) f32."""
    N, G, KKCg_pad, M_pad = patches.shape
    Cout_g = w2.shape[1]
    num_m = M_pad // m_tile
    num_k = KKCg_pad // k_tile
    need_mask = (M_pad != M)

    cost = pl.CostEstimate(
        flops=2 * N * G * Cout_g * KKCg_pad * M_pad,
        transcendentals=0,
        bytes_accessed=(patches.size * 2 + w2.size * 2
                        + N * G * Cout_g * M_pad * 4),
    )

    y, psum, psq = pl.pallas_call(
        _make_conv_bn_kernel(M, m_tile, need_mask),
        out_shape=(
            jax.ShapeDtypeStruct((N, G, Cout_g, M_pad), jnp.float32),
            jax.ShapeDtypeStruct((G, N, num_m, Cout_g, 1), jnp.float32),
            jax.ShapeDtypeStruct((G, N, num_m, Cout_g, 1), jnp.float32),
        ),
        grid=(G, N, num_m, num_k),
        in_specs=[
            pl.BlockSpec((1, 1, k_tile, m_tile), lambda g, n, m, k: (n, g, k, m)),
            pl.BlockSpec((1, Cout_g, k_tile), lambda g, n, m, k: (g, 0, k)),
            pl.BlockSpec((1, Cout_g, 1), lambda g, n, m, k: (g, 0, 0)),
        ],
        out_specs=(
            pl.BlockSpec((1, 1, Cout_g, m_tile), lambda g, n, m, k: (n, g, 0, m)),
            pl.BlockSpec((1, 1, 1, Cout_g, 1), lambda g, n, m, k: (g, n, m, 0, 0)),
            pl.BlockSpec((1, 1, 1, Cout_g, 1), lambda g, n, m, k: (g, n, m, 0, 0)),
        ),
        scratch_shapes=[pltpu.VMEM((Cout_g, m_tile), jnp.float32)],
        compiler_params=pltpu.CompilerParams(
            dimension_semantics=("parallel", "parallel", "parallel", "arbitrary"),
            vmem_limit_bytes=vmem_limit,
        ),
        cost_estimate=cost,
    )(patches, w2, b2)
    return y, psum[..., 0], psq[..., 0]


# ----------------------------------------------------------------------------
# Kernel 2: apply per-channel scale/shift + LeakyReLU(0.1), streaming tiles.
# ----------------------------------------------------------------------------
def _make_bn_apply_kernel(slope):
    def kernel(y_ref, scale_ref, shift_ref, o_ref):
        out = y_ref[0] * scale_ref[...] + shift_ref[...]   # (C,1) broadcast over lanes
        o_ref[0] = jnp.where(out >= 0, out, slope * out)
    return kernel


def bn_apply_pallas(y, scale, shift, *, m_tile, slope, vmem_limit):
    N, C, M_pad = y.shape
    return pl.pallas_call(
        _make_bn_apply_kernel(slope),
        out_shape=jax.ShapeDtypeStruct((N, C, M_pad), jnp.float32),
        grid=(N, M_pad // m_tile),
        in_specs=[
            pl.BlockSpec((1, C, m_tile), lambda n, m: (n, 0, m)),
            pl.BlockSpec((C, 1), lambda n, m: (0, 0)),
            pl.BlockSpec((C, 1), lambda n, m: (0, 0)),
        ],
        out_specs=pl.BlockSpec((1, C, m_tile), lambda n, m: (n, 0, m)),
        compiler_params=pltpu.CompilerParams(
            dimension_semantics=("parallel", "parallel"),
            vmem_limit_bytes=vmem_limit,
        ),
    )(y, scale, shift)


# ----------------------------------------------------------------------------
# Full ConvolutionalLayer forward (NCHW in, NCHW out).
# ----------------------------------------------------------------------------
def convolutional_layer_forward(x_nchw, params, *, stride, padding, groups,
                                eps=1e-5, slope=0.1):
    w = params["conv_w"]        # (Cout, Cin/groups, K, K)  PyTorch OIHW
    b = params["conv_b"]        # (Cout,)  (zeros for bias=False)
    gamma = params["bn_gamma"]  # (Cout,)
    beta = params["bn_beta"]    # (Cout,)

    N, Cin, H, W = x_nchw.shape
    Cout, Cin_g, K, _ = w.shape
    G = groups
    Cout_g = Cout // G
    assert Cin == Cin_g * G and Cout_g * G == Cout

    Ho = (H + 2 * padding - K) // stride + 1
    Wo = (W + 2 * padding - K) // stride + 1
    M = Ho * Wo
    KKCg = Cin_g * K * K

    vmem_limit = _vmem_limit_bytes()
    m_tile, M_pad, k_tile, KKCg_pad = _conv_tile_plan(KKCg, Cout_g, M, vmem_limit)
    num_m = M_pad // m_tile

    # im2col in the wrapper (XLA): feature order (cin, kh, kw) matches the OIHW
    # weight flattening; operands quantized to bf16 for the MXU.
    x_pad = jnp.pad(
        x_nchw, ((0, 0), (0, 0), (padding, padding), (padding, padding))
    ).astype(jnp.bfloat16)
    taps = []
    for kh in range(K):
        for kw in range(K):
            taps.append(
                x_pad[:, :,
                      kh:kh + (Ho - 1) * stride + 1:stride,
                      kw:kw + (Wo - 1) * stride + 1:stride])
    patches = jnp.stack(taps, axis=2)                     # (N, Cin, K*K, Ho, Wo)
    patches = patches.reshape(N, Cin * K * K, M).reshape(N, G, KKCg, M)
    pad_k = KKCg_pad - KKCg
    pad_m = M_pad - M
    if pad_k or pad_m:
        patches = jnp.pad(patches, ((0, 0), (0, 0), (0, pad_k), (0, pad_m)))

    w2 = w.reshape(G, Cout_g, KKCg).astype(jnp.bfloat16)
    if pad_k:
        w2 = jnp.pad(w2, ((0, 0), (0, 0), (0, pad_k)))
    b2 = b.reshape(G, Cout_g, 1).astype(jnp.float32)

    # Fused conv + per-tile BN partial statistics.
    y, psum, psq = conv_bn_stats_pallas(
        patches, w2, b2, m_tile=m_tile, k_tile=k_tile, M=M, vmem_limit=vmem_limit)

    # Chunked (per-tile shifted) variance combination on tiny (G,N,num_m,Cout_g)
    # arrays; avoids the global E[x^2]-E[x]^2 cancellation.
    counts = jnp.full((num_m,), float(m_tile), jnp.float32)
    if M_pad != M:
        counts = counts.at[-1].set(float(M - (num_m - 1) * m_tile))
    cnt = counts[None, None, :, None]
    total = float(N * M)
    mean_t = psum / cnt
    m2_t = psq - psum * mean_t
    mean = jnp.sum(psum, axis=(1, 2)) / total                       # (G, Cout_g)
    m2 = (jnp.sum(m2_t, axis=(1, 2))
          + jnp.sum(cnt * jnp.square(mean_t - mean[:, None, None, :]), axis=(1, 2)))
    var = m2 / total                                                # biased (training BN)

    mean = mean.reshape(Cout, 1)
    var = var.reshape(Cout, 1)
    scale = gamma.reshape(Cout, 1).astype(jnp.float32) * lax.rsqrt(var + eps)
    shift = beta.reshape(Cout, 1).astype(jnp.float32) - mean * scale

    z = bn_apply_pallas(y.reshape(N, Cout, M_pad), scale, shift,
                        m_tile=m_tile, slope=slope, vmem_limit=vmem_limit)
    if M_pad != M:
        z = z[:, :, :M]        # only when no 128-aligned tiling of M exists
    return z.reshape(N, Cout, Ho, Wo)


# ----------------------------------------------------------------------------
# Pure-JAX reference (same semantics; same bf16 MXU operand quantization).
# ----------------------------------------------------------------------------
def reference_forward(x_nchw, params, *, stride, padding, groups,
                      eps=1e-5, slope=0.1):
    w = params["conv_w"]
    b = params["conv_b"]
    gamma = params["bn_gamma"]
    beta = params["bn_beta"]
    y = lax.conv_general_dilated(
        x_nchw.astype(jnp.bfloat16), w.astype(jnp.bfloat16),
        window_strides=(stride, stride),
        padding=[(padding, padding), (padding, padding)],
        dimension_numbers=("NCHW", "OIHW", "NCHW"),
        feature_group_count=groups,
        preferred_element_type=jnp.float32,
    ) + b.reshape(1, -1, 1, 1)
    mean = jnp.mean(y, axis=(0, 2, 3), keepdims=True)
    var = jnp.mean(jnp.square(y - mean), axis=(0, 2, 3), keepdims=True)
    out = (y - mean) * lax.rsqrt(var + eps) * gamma.reshape(1, -1, 1, 1) \
        + beta.reshape(1, -1, 1, 1)
    return jnp.where(out >= 0, out, slope * out)


def _run_case(key, *, N, Cin, Cout, K, stride, padding, groups, H, W):
    kx, kw = jax.random.split(key)
    x = jax.random.normal(kx, (N, Cin, H, W), dtype=jnp.float32)
    conv_w = 0.1 * jax.random.normal(
        kw, (Cout, Cin // groups, K, K), dtype=jnp.float32)
    conv_b = jnp.zeros((Cout,), dtype=jnp.float32)  # bias=False
    bn_gamma = 1.0 + 0.05 * jnp.arange(Cout, dtype=jnp.float32)
    bn_beta = 0.01 * jnp.arange(Cout, dtype=jnp.float32)
    params = dict(conv_w=conv_w, conv_b=conv_b, bn_gamma=bn_gamma, bn_beta=bn_beta)

    out = convolutional_layer_forward(
        x, params, stride=stride, padding=padding, groups=groups)
    out = jax.block_until_ready(out)
    ref = reference_forward(
        x, params, stride=stride, padding=padding, groups=groups)
    ref = jax.block_until_ready(ref)

    Ho = (H + 2 * padding - K) // stride + 1
    Wo = (W + 2 * padding - K) // stride + 1
    assert out.shape == (N, Cout, Ho, Wo), out.shape
    assert bool(jnp.all(jnp.isfinite(out)))
    err = float(jnp.max(jnp.abs(out - ref)))
    assert jnp.allclose(out, ref, rtol=2e-3, atol=2e-3), err


if __name__ == "__main__":
    key = jax.random.PRNGKey(0)
    k1, k2 = jax.random.split(key)

    # Typical YOLO ConvolutionalLayer block: 3x3, stride 1, pad 1, groups 1.
    _run_case(k1, N=2, Cin=4, Cout=8, K=3, stride=1, padding=1, groups=1, H=16, W=16)
    # Grouped / strided variant (exercises groups grid axis + full-extent M tile).
    _run_case(k2, N=2, Cin=4, Cout=8, K=3, stride=2, padding=1, groups=2, H=16, W=16)

    print("KERNEL_OK")
</pallas_src>

<mosaic_0001>
module attributes {stable_mosaic.version = 11 : i64} {
  func.func @kernel(%arg0: i32, %arg1: i32, %arg2: i32, %arg3: i32, %arg4: memref<1x1x40x256xbf16, #tpu.memory_space<vmem>>, %arg5: memref<1x8x40xbf16, #tpu.memory_space<vmem>>, %arg6: memref<1x8x1xf32, #tpu.memory_space<vmem>>, %arg7: memref<1x1x8x256xf32, #tpu.memory_space<vmem>>, %arg8: memref<1x1x1x8x1xf32, #tpu.memory_space<vmem>>, %arg9: memref<1x1x1x8x1xf32, #tpu.memory_space<vmem>>, %arg10: memref<8x256xf32, #tpu.memory_space<vmem>>) attributes {dimension_semantics = [#tpu.dimension_semantics<parallel>, #tpu.dimension_semantics<parallel>, #tpu.dimension_semantics<parallel>, #tpu.dimension_semantics<arbitrary>], iteration_bounds = array<i64: 1, 2, 1, 1>, scalar_prefetch = 0 : i64, scratch_operands = 1 : i64, tpu.core_type = #tpu.core_type<tc>, window_params = [{transform_indices = @transform_0, window_bounds = array<i64: 1, 1, 40, 256>}, {transform_indices = @transform_1, window_bounds = array<i64: 1, 8, 40>}, {transform_indices = @transform_2, window_bounds = array<i64: 1, 8, 1>}, {transform_indices = @transform_3, window_bounds = array<i64: 1, 1, 8, 256>}, {transform_indices = @transform_4, window_bounds = array<i64: 1, 1, 1, 8, 1>}, {transform_indices = @transform_5, window_bounds = array<i64: 1, 1, 1, 8, 1>}]} {
    %c0_i32 = arith.constant 0 : i32
    %0 = arith.cmpi eq, %arg3, %c0_i32 : i32
    %1 = arith.extui %0 : i1 to i32
    %c0_i32_0 = arith.constant 0 : i32
    %2 = arith.cmpi ne, %1, %c0_i32_0 : i32
    scf.if %2 {
      %cst_13 = arith.constant 0.000000e+00 : f32
      %14 = vector.broadcast %cst_13 : f32 to vector<8x256xf32>
      %c0_14 = arith.constant 0 : index
      %c0_15 = arith.constant 0 : index
      %15 = vector.load %arg10[%c0_14, %c0_15] : memref<8x256xf32, #tpu.memory_space<vmem>>, vector<8x256xf32>
      tpu.vector_store %arg10[%c0_14, %c0_15], %14 {strides = array<i32>} : memref<8x256xf32, #tpu.memory_space<vmem>>, vector<8x256xf32>,
    } else {
    }
    %c0 = arith.constant 0 : index
    %c0_1 = arith.constant 0 : index
    %3 = vector.load %arg10[%c0, %c0_1] : memref<8x256xf32, #tpu.memory_space<vmem>>, vector<8x256xf32>
    %c0_2 = arith.constant 0 : index
    %c0_3 = arith.constant 0 : index
    %c0_4 = arith.constant 0 : index
    %4 = vector.load %arg5[%c0_2, %c0_3, %c0_4] : memref<1x8x40xbf16, #tpu.memory_space<vmem>>, vector<1x8x40xbf16>
    %5 = vector.shape_cast %4 : vector<1x8x40xbf16> to vector<8x40xbf16>
    %c0_5 = arith.constant 0 : index
    %c0_6 = arith.constant 0 : index
    %c0_7 = arith.constant 0 : index
    %c0_8 = arith.constant 0 : index
    %6 = vector.load %arg4[%c0_5, %c0_6, %c0_7, %c0_8] : memref<1x1x40x256xbf16, #tpu.memory_space<vmem>>, vector<1x1x40x256xbf16>
    %7 = vector.shape_cast %6 : vector<1x1x40x256xbf16> to vector<40x256xbf16>
    %cst = arith.constant dense<0.000000e+00> : vector<8x256xf32>
    %8 = tpu.matmul %5, %7, %cst {dimension_numbers = #tpu.dot_dimension_numbers<[1], [0], [0], [1], [0, 0, 1, 1], [], []>} : vector<8x40xbf16>, vector<40x256xbf16>, vector<8x256xf32> -> vector<8x256xf32>
    %9 = arith.addf %3, %8 : vector<8x256xf32>
    %c0_9 = arith.constant 0 : index
    %c0_10 = arith.constant 0 : index
    %10 = vector.load %arg10[%c0_9, %c0_10] : memref<8x256xf32, #tpu.memory_space<vmem>>, vector<8x256xf32>
    tpu.vector_store %arg10[%c0_9, %c0_10], %9 {strides = array<i32>} : memref<8x256xf32, #tpu.memory_space<vmem>>, vector<8x256xf32>,
    %c0_i32_11 = arith.constant 0 : i32
    %11 = arith.cmpi eq, %arg3, %c0_i32_11 : i32
    %12 = arith.extui %11 : i1 to i32
    %c0_i32_12 = arith.constant 0 : i32
    %13 = arith.cmpi ne, %12, %c0_i32_12 : i32
    scf.if %13 {
      %c0_13 = arith.constant 0 : index
      %c0_14 = arith.constant 0 : index
      %14 = vector.load %arg10[%c0_13, %c0_14] : memref<8x256xf32, #tpu.memory_space<vmem>>, vector<8x256xf32>
      %c0_15 = arith.constant 0 : index
      %c0_16 = arith.constant 0 : index
      %c0_17 = arith.constant 0 : index
      %15 = vector.load %arg6[%c0_15, %c0_16, %c0_17] : memref<1x8x1xf32, #tpu.memory_space<vmem>>, vector<1x8x1xf32>
      %16 = vector.shape_cast %15 : vector<1x8x1xf32> to vector<8x1xf32>
      %17 = vector.broadcast %16 : vector<8x1xf32> to vector<8x256xf32>
      %18 = arith.addf %14, %17 : vector<8x256xf32>
      %c0_18 = arith.constant 0 : index
      %c0_19 = arith.constant 0 : index
      %c0_20 = arith.constant 0 : index
      %c0_21 = arith.constant 0 : index
      %19 = vector.load %arg7[%c0_18, %c0_19, %c0_20, %c0_21] : memref<1x1x8x256xf32, #tpu.memory_space<vmem>>, vector<1x1x8x256xf32>
      %20 = vector.shape_cast %19 : vector<1x1x8x256xf32> to vector<8x256xf32>
      %21 = vector.shape_cast %18 : vector<8x256xf32> to vector<1x1x8x256xf32>
      tpu.vector_store %arg7[%c0_18, %c0_19, %c0_20, %c0_21], %21 {strides = array<i32>} : memref<1x1x8x256xf32, #tpu.memory_space<vmem>>, vector<1x1x8x256xf32>,
      %cst_22 = arith.constant dense<0.000000e+00> : vector<8xf32>
      %22 = vector.multi_reduction <add>, %18, %cst_22 [1] : vector<8x256xf32> to vector<8xf32>
      %23 = vector.shape_cast %22 : vector<8xf32> to vector<8x1xf32>
      %c0_23 = arith.constant 0 : index
      %c0_24 = arith.constant 0 : index
      %c0_25 = arith.constant 0 : index
      %c0_26 = arith.constant 0 : index
      %c0_27 = arith.constant 0 : index
      %24 = vector.load %arg8[%c0_23, %c0_24, %c0_25, %c0_26, %c0_27] : memref<1x1x1x8x1xf32, #tpu.memory_space<vmem>>, vector<1x1x1x8x1xf32>
      %25 = vector.shape_cast %24 : vector<1x1x1x8x1xf32> to vector<8x1xf32>
      %26 = vector.shape_cast %23 : vector<8x1xf32> to vector<1x1x1x8x1xf32>
      tpu.vector_store %arg8[%c0_23, %c0_24, %c0_25, %c0_26, %c0_27], %26 {strides = array<i32>} : memref<1x1x1x8x1xf32, #tpu.memory_space<vmem>>, vector<1x1x1x8x1xf32>,
      %27 = arith.mulf %18, %18 : vector<8x256xf32>
      %cst_28 = arith.constant dense<0.000000e+00> : vector<8xf32>
      %28 = vector.multi_reduction <add>, %27, %cst_28 [1] : vector<8x256xf32> to vector<8xf32>
      %29 = vector.shape_cast %28 : vector<8xf32> to vector<8x1xf32>
      %c0_29 = arith.constant 0 : index
      %c0_30 = arith.constant 0 : index
      %c0_31 = arith.constant 0 : index
      %c0_32 = arith.constant 0 : index
      %c0_33 = arith.constant 0 : index
      %30 = vector.load %arg9[%c0_29, %c0_30, %c0_31, %c0_32, %c0_33] : memref<1x1x1x8x1xf32, #tpu.memory_space<vmem>>, vector<1x1x1x8x1xf32>
      %31 = vector.shape_cast %30 : vector<1x1x1x8x1xf32> to vector<8x1xf32>
      %32 = vector.shape_cast %29 : vector<8x1xf32> to vector<1x1x1x8x1xf32>
      tpu.vector_store %arg9[%c0_29, %c0_30, %c0_31, %c0_32, %c0_33], %32 {strides = array<i32>} : memref<1x1x1x8x1xf32, #tpu.memory_space<vmem>>, vector<1x1x1x8x1xf32>,
    } else {
    }
    return
  }
  func.func @transform_0(%arg0: i32, %arg1: i32, %arg2: i32, %arg3: i32) -> (i32, i32, i32, i32) {
    %c0_i32 = arith.constant 0 : i32
    return %arg1, %arg0, %arg3, %arg2 : i32, i32, i32, i32
  }
  func.func @transform_1(%arg0: i32, %arg1: i32, %arg2: i32, %arg3: i32) -> (i32, i32, i32) {
    %c0_i32 = arith.constant 0 : i32
    %c0_i32_0 = arith.constant 0 : i32
    return %arg0, %c0_i32, %arg3 : i32, i32, i32
  }
  func.func @transform_2(%arg0: i32, %arg1: i32, %arg2: i32, %arg3: i32) -> (i32, i32, i32) {
    %c0_i32 = arith.constant 0 : i32
    %c0_i32_0 = arith.constant 0 : i32
    %c0_i32_1 = arith.constant 0 : i32
    return %arg0, %c0_i32, %c0_i32_0 : i32, i32, i32
  }
  func.func @transform_3(%arg0: i32, %arg1: i32, %arg2: i32, %arg3: i32) -> (i32, i32, i32, i32) {
    %c0_i32 = arith.constant 0 : i32
    %c0_i32_0 = arith.constant 0 : i32
    return %arg1, %arg0, %c0_i32, %arg2 : i32, i32, i32, i32
  }
  func.func @transform_4(%arg0: i32, %arg1: i32, %arg2: i32, %arg3: i32) -> (i32, i32, i32, i32, i32) {
    %c0_i32 = arith.constant 0 : i32
    %c0_i32_0 = arith.constant 0 : i32
    %c0_i32_1 = arith.constant 0 : i32
    return %arg0, %arg1, %arg2, %c0_i32, %c0_i32_0 : i32, i32, i32, i32, i32
  }
  func.func @transform_5(%arg0: i32, %arg1: i32, %arg2: i32, %arg3: i32) -> (i32, i32, i32, i32, i32) {
    %c0_i32 = arith.constant 0 : i32
    %c0_i32_0 = arith.constant 0 : i32
    %c0_i32_1 = arith.constant 0 : i32
    return %arg0, %arg1, %arg2, %c0_i32, %c0_i32_0 : i32, i32, i32, i32, i32
  }
}

</mosaic_0001>

<bundles_post_ra>
// kernel: tpu_custom_call.1
= control target key start
LH: loop header
LB: loop body
LE: loop exit
PB: predicated region body
PF: predicated region fallthrough
CT: control target
= control target key end

     0   :  { %s1453_s0 = inlined_call_operand.hbm [shape: bf16[2,1,40,256], index: 0, kind: input, shape index: {}]   ;;  %s1454_s1 = inlined_call_operand.hbm [shape: bf16[1,8,40], index: 1, kind: input, shape index: {}]   ;;  %s1455_s2 = inlined_call_operand.hbm [shape: f32[1,8,1], index: 2, kind: input, shape index: {}]   ;;  %s1456_s3 = inlined_call_operand.hbm [shape: f32[2,1,8,256], index: 3, kind: output, shape index: {0}]   ;;  %s1457_s4 = inlined_call_operand.hbm [shape: f32[1,2,1,8,1], index: 4, kind: output, shape index: {1}]   ;;  %s1458_s5 = inlined_call_operand.hbm [shape: f32[1,2,1,8,1], index: 5, kind: output, shape index: {2}]  }
   0x1   :  { %1465 = sst [smem:[#allocation17_spill]] %s1454_s1 }
   0x2   :  { %11 = vsyncpa [#allocation4], 0 }
   0x3   :  { %13 = vsyncpa [#allocation4 + $0x1], 0 }
   0x4   :  { %14 = vsyncpa [#allocation7], 0 }
   0x5   :  { %15 = vsyncpa [#allocation5], 0 }
   0x6   :  { %17 = vsyncpa [#allocation5 + $0x1], 0 }
   0x7   :  { %18 = vsyncpa [#allocation11], 0 }
   0x8   :  { %20 = vsyncpa [#allocation11 + $0x1], 0  ;;  %s1139_s18 = smov 0   ;;  %s1141_s19 = smov 0  }
   0x9   :  { %s1143_s20 = smov 0   ;;  %s1145_s21 = smov 0  }
   0xa   :  { %s1147_s22 = smov 0   ;;  %s1149_s23 = smov 0  }
   0xb LB: > { %s1170_s24 = sadd.s32 4294967295, %s1098_s23   ;;  %s1464_s25 = sadd.s32 4294967294, %s1098_s23   ;;  %s1098_s23 = sphi %s1149_s23, %s26_s23   ;;  %s1094_s22 = sphi %s1147_s22, %s1487_s22   ;;  %s1090_s21 = sphi %s1145_s21, %s1486_s21   ;;  %s1086_s20 = sphi %s1143_s20, %s1485_s20   ;;  %s1082_s19 = sphi %s1141_s19, %s1484_s19   ;;  %s1078_s18 = sphi %s1139_s18, %s1483_s18  }
   0xc   : > { %s65_s26 = sadd.s32 1, %s1086_s20  ;;  %p72_p0 = scmp.ne.s32.totalorder %s1086_s20, %s1082_s19 }
   0xd   : > { %p73_p1 = scmp.eq.s32.totalorder %s1098_s23, 0  ;;  %p78_p2 = scmp.ne.s32.totalorder %s1082_s19, %s1078_s18 }
   0xe   : > { %p1459_p3 = scmp.eq.s32.totalorder %s1170_s24, 0  ;;  %p160_p4 = scmp.eq.s32.totalorder %s1170_s24, 1 }
   0xf   : > { %p1181_p5 = por %p73_p1, %p72_p0  ;;  %p166_p6 = scmp.eq.s32.totalorder %s1464_s25, 1 }
  0x10   : > { %p1189_p7 = por %p1459_p3, %p78_p2  ;;  %p1193_p8 = por %p160_p4, %p72_p0 }
  0x11   : > { %p1197_p9 = por %p166_p6, %p78_p2  ;;  %p729_p10 = scmp.ge.s32.totalorder %s1098_s23, 1 }
  0x12   : > { %s1467_s28 = scalar_select %p1189_p7, 1, 0 }
  0x13   : > { %s1468_s29 = scalar_select %p1193_p8, 1, 0 }
  0x14   : > { %s1469_s30 = scalar_select %p1197_p9, 1, 0 }
  0x15   : > { %p233_p11 = scmp.lt.s32.totalorder %s1098_s23, 3  ;;  %s1100_s7 = smov [#allocation6]  }
  0x16   : > { %s249_s8 = sshll.u32 %s1100_s7, 4  ;;  %p800_p1 = scmp.lt.s32.totalorder %s1098_s23, 2  ;;  %s250_s8 = int_to_ptr.vmem [resolvable:$true] %s249_s8 }
  0x17   : > { %p1204_p13 = pnand %p729_p10, %p233_p11  ;;  %s1101_s10 = smov [#allocation8]  }
  0x18   : > { %p1213_p4 = pnand %p800_p1, %p1181_p5  ;;  %s262_s11 = sshll.u32 %s1101_s10, 4  ;;  %s1223_s11 = int_to_ptr.vmem [resolvable:$true] %s262_s11 }
  0x19   : > { %s1470_s6 = scalar_select %p1204_p13, 1, 0 }
  0x1a   : > { %p777_p0 = pneg %p1204_p13  ;;  %s1473_s1 = sld [smem:[#allocation17_spill]] }
  0x1b   : > { %s1471_s9 = scalar_select %p1213_p4, 1, 0 }
  0x1c   : > { %p1219_p2 = pnand %p777_p0, %p1459_p3 }
  0x1e   : > { %p868_p6 = pneg %p1219_p2 }
  0x20   : > { %s866_s15 = scalar_lea.hbm %s1473_s1, 64 }
  0x21   : > { %p867_p5 = scmp.ne.s32.totalorder %s1473_s1, %s866_s15  ;;  %p873_p1 = scmp.lt.u32.totalorder %s866_s15, %s1473_s1 }
  0x23   : > { %p869_p10 = pnand %p868_p6, %p867_p5 }
  0x25   : > { %p870_p11 = pneg %p869_p10 }
  0x27   : > { %p875_p0 = pnand %p873_p1, %p870_p11 }
  0x29   : > { %878 = shalt.err (!%p875_p0)
}
  0x2a   : > { %s879_s10 = scalar_lea.vmem %s250_s8, 64  ;;  %p887_p8 = scmp.lt.s32.totalorder %s250_s8, %s250_s8 }
  0x2b   : > { %p880_p12 = scmp.ne.s32.totalorder %s250_s8, %s879_s10  ;;  %p888_p7 = scmp.lt.s32.totalorder %s879_s10, %s879_s10 }
  0x2d   : > { %p882_p3 = pnand %p880_p12, %p868_p6  ;;  %p889_p13 = por %p888_p7, %p887_p8 }
  0x2f   : > { %p883_p9 = pneg %p882_p3 }
  0x31   : > { %p890_p4 = pnand %p889_p13, %p883_p9 }
  0x33   : > { %893 = shalt.err (!%p890_p4)
}
  0x34   : > { %780 = dma.hbm_to_vmem [thread:$0]  (!%p1219_p2), %s1473_s1, 64, %s250_s8, [#allocation7]  }
  0x35   : > { %s894_s17 = scalar_lea.hbm %s1455_s2, 128 }
  0x36   : > { %p895_p3 = scmp.ne.s32.totalorder %s1455_s2, %s894_s17  ;;  %p901_p9 = scmp.lt.u32.totalorder %s894_s17, %s1455_s2 }
  0x38   : > { %p897_p7 = pnand %p895_p3, %p868_p6 }
  0x3a   : > { %p898_p8 = pneg %p897_p7 }
  0x3c   : > { %p903_p12 = pnand %p901_p9, %p898_p8 }
  0x3e   : > { %906 = shalt.err (!%p903_p12)
}
  0x3f   : > { %s907_s8 = scalar_lea.vmem %s1223_s11, 128  ;;  %p915_p10 = scmp.lt.s32.totalorder %s1223_s11, %s1223_s11 }
  0x40   : > { %p908_p13 = scmp.ne.s32.totalorder %s1223_s11, %s907_s8  ;;  %p916_p11 = scmp.lt.s32.totalorder %s907_s8, %s907_s8 }
  0x42   : > { %p910_p4 = pnand %p908_p13, %p868_p6  ;;  %p917_p1 = por %p916_p11, %p915_p10 }
  0x44   : > { %p911_p5 = pneg %p910_p4 }
  0x46   : > { %p918_p0 = pnand %p917_p1, %p911_p5 }
  0x48   : > { %921 = shalt.err (!%p918_p0)
}
  0x49   : > { %783 = dma.hbm_to_vmem [thread:$0]  (!%p1219_p2), %s1455_s2, 128, %s1223_s11, [#allocation7]  }
  0x4a   : > { %s48_s14 = sadd.s32 1, %s1094_s22  ;;  %s273_s15 = sand.u32 1, %s1086_s20  }
  0x4b   : > { %p50_p6 = scmp.ge.s32.totalorder %s48_s14, 2  ;;  %s758_s16 = smul.u32 40, %s273_s15 }
  0x4c   : > { %s759_s12 = smul.u32 640, %s1094_s22  ;;  %s1291_s13 = scalar_lea.sflag [#allocation4], %s273_s15 }
  0x4d   : > { %s1489_s14 = smov (%p50_p6, %s48_s14), 0  ;;  %s277_s27 = scalar_lea.vmem [#allocation3], %s758_s16 }
  0x4e   : > { %s56_s17 = ssub.s32 %s1094_s22, %s1489_s14  ;;  %s291_s7 = sshll.u32 %s277_s27, 4  ;;  %s1284_s7 = int_to_ptr.vmem [resolvable:$true] %s291_s7 }
  0x4f   : > { %p63_p3 = scmp.eq.s32.totalorder %s56_s17, 0  ;;  %s1282_s25 = scalar_lea.hbm %s1453_s0, %s759_s12 }
  0x50   : > { %s922_s1 = scalar_lea.hbm %s1282_s25, 640  ;;  %p1474_p7 = scmp.ne.s32.totalorder %s1471_s9, 0 }
  0x51   : > { %s1289_s11 = scalar_select %p63_p3, %s1086_s20, %s65_s26  }
  0x52   : > { %p923_p2 = scmp.ne.s32.totalorder %s1282_s25, %s922_s1  ;;  %p924_p8 = pneg %p1474_p7 }
  0x53   : > { %s927_s17 = scalar_lea.hbm %s1453_s0, 1280  ;;  %p928_p13 = scmp.lt.u32.totalorder %s1282_s25, %s1453_s0 }
  0x54   : > { %p925_p9 = pnand %p924_p8, %p923_p2  ;;  %p929_p4 = scmp.lt.u32.totalorder %s927_s17, %s922_s1 }
  0x55   : > { %p931_p10 = scmp.lt.u32.totalorder %s922_s1, %s1282_s25 }
  0x56   : > { %p926_p12 = pneg %p925_p9  ;;  %p930_p5 = por %p929_p4, %p928_p13 }
  0x58   : > { %p932_p11 = por %p931_p10, %p930_p5 }
  0x5a   : > { %p933_p1 = pnand %p932_p11, %p926_p12 }
  0x5c   : > { %936 = shalt.err (!%p933_p1)
}
  0x5d   : > { %s937_s26 = scalar_lea.vmem %s1284_s7, 640  ;;  %s1102_s15 = smov [#allocation3]  }
  0x5e   : > { %p938_p0 = scmp.ne.s32.totalorder %s1284_s7, %s937_s26  ;;  %s942_s8 = sshll.u32 %s1102_s15, 4  ;;  %s943_s8 = int_to_ptr.vmem [resolvable:$false] %s942_s8 }
  0x5f   : > { %s944_s16 = scalar_lea.vmem %s943_s8, 1280  ;;  %p945_p2 = scmp.lt.s32.totalorder %s1284_s7, %s943_s8 }
  0x60   : > { %p940_p6 = pnand %p938_p0, %p924_p8  ;;  %p946_p9 = scmp.lt.s32.totalorder %s944_s16, %s937_s26 }
  0x62   : > { %p941_p3 = pneg %p940_p6  ;;  %p947_p13 = por %p946_p9, %p945_p2 }
  0x64   : > { %p948_p4 = pnand %p947_p13, %p941_p3 }
  0x66   : > { %951 = shalt.err (!%p948_p4)
}
  0x67   : > { %s1103_s1 = smov 128   ;;  %s1104_s12 = smov 8  }
  0x68   : > { %787 = dma.hbm_to_vmem [thread:$0]  (!%p1474_p7), %s1282_s25, 640, %s1284_s7, %s1291_s13, %s1103_s1, %s1103_s1, %s1104_s12  }
  0x69   : > { %p1475_p8 = scmp.ne.s32.totalorder %s1470_s6, 0 }
  0x6a   : > { %s1322_s17 = sand.u32 (!%p1475_p8), 1, %s1082_s19   ;;  %p1476_p12 = scmp.ne.s32.totalorder (!%p1475_p8), %s1467_s28, 0 }
  0x6b   : > { %303 = sbr.rel (%p1475_p8) target bundleno = 528 (0x210), region = 32  ;;  %s306_s10 = scalar_lea.sflag (!%p1475_p8), [#allocation4], %s1322_s17 }
  0x6c   : > { %s760_s27 = smul.u32 (!%p1475_p8), 40, %s1322_s17 }
  0x6e   : > { %s309_s26 = scalar_lea.vmem (!%p1475_p8), [#allocation3], %s760_s27 }
  0x72   : > { %1061 = dma.done.wait (%p1476_p12), %s306_s10, 640  }
  0x73   : > { %1063 = vsyncadd (%p1476_p12), %s306_s10, 4294966656  ;;  %p1477_p5 = scmp.eq.s32.totalorder %s1170_s24, 0 }
  0x75   : > { %1065 = dma.done.wait (%p1477_p5), [#allocation7], 192   ;;  %p1478_p7 = pmov %p1477_p5 }
  0x76   : > { %v1105_v0 = vmov 0   ;;  %v858_v1 = vld [vmem:[%s309_s26 + $0x4] ss:$8 sps:$4 sm:$0xff]   ;;  %v860_v2 = vld [vmem:[%s309_s26] ss:$8 sps:$4 sm:$0xff]   ;;  %vm401_vm0 = vcmask 1043456  }
  0x77   : > { %1067 = vsyncadd (%p1478_p7), [#allocation7], 4294967104  ;;  %440 = vmatprep.mubr.bf16.mxu0 %v1105_v0  ;;  %857 = vset.pattern.permute.xlu0 %v1105_v0  ;;  %v861_v3 = vld [vmem:[%s309_s26 + $0x14] ss:$8 sps:$4 sm:$0xff]   ;;  %v371_v4 = vld [vmem:[%s309_s26 + $0x20] sm:$0xff]  ;;  %vm397_vm1 = vcmask 326656  }
  0x78   : > { %408 = vmatprep.subr.bf16.mxu0 %v858_v1  ;;  %v863_v5 = vld [vmem:[%s309_s26 + $0x10] ss:$8 sps:$4 sm:$0xff]   ;;  %v745_v7 = vcombine.high %v371_v4, %v371_v4  ;;  %v744_v8 = vcombine.low %v371_v4, %v371_v4  ;;  %s737_s28 = sshll.u32 %s1322_s17, 4  ;;  %s757_s9 = sshll.u32 %s1090_s21, 8 }
  0x79   : > { %409 = vmatpush1.bf16.msra.mxu0 %v860_v2  ;;  %v458_v6 = vld [vmem:[#allocation8] sm:$0xff]  ;;  %v366_v10 = vld [vmem:[#allocation6] sm:$0xf]  ;;  %s339_s6 = scalar_lea.vmem [#allocation9], %s737_s28  ;;  %s1339_s15 = scalar_lea.hbm %s1456_s3, %s757_s9 }
  0x7a   : > { %410 = vmatprep.subr.bf16.mxu0 %v861_v3  ;;  %461 = vperm.xlu0 %857, %v458_v6   ;;  %v403_v9 = vsel %vm401_vm0, %v744_v8, 0  ;;  %s508_s7 = sshll.u32 %s339_s6, 4  ;;  %s480_s8 = scalar_lea.sflag [#allocation5], %s1322_s17  ;;  %s509_s7 = int_to_ptr.vmem [resolvable:$true] %s508_s7 }
  0x7b   : > { %s952_s16 = scalar_lea.vmem %s509_s7, 256  ;;  %p1479_p11 = scmp.ne.s32.totalorder %s1468_s29, 0 }
  0x7c   : > { %p953_p10 = scmp.ne.s32.totalorder %s509_s7, %s952_s16  ;;  %s1106_s1 = smov [#allocation9]  }
  0x7d   : > { %411 = vmatpush1.bf16.msra.mxu0 %v863_v5  ;;  %s956_s12 = sshll.u32 %s1106_s1, 4  ;;  %s957_s12 = int_to_ptr.vmem [resolvable:$false] %s956_s12 }
  0x7e   : > { %746 = vmatprep.subr.msk.bf16.mxu0 %vm401_vm0, %v745_v7  ;;  %p954_p1 = pnand %p953_p10, %p1479_p11  ;;  %s958_s27 = scalar_lea.vmem %s957_s12, 512 }
  0x7f   : > { %p959_p6 = scmp.lt.s32.totalorder %s509_s7, %s957_s12  ;;  %p960_p3 = scmp.lt.s32.totalorder %s958_s27, %s952_s16 }
  0x80   : > { %p955_p0 = pneg %p954_p1 }
  0x81   : > { %413 = vmatpush1.bf16.msra.mxu0 %v403_v9  ;;  %p961_p2 = por %p960_p3, %p959_p6 }
  0x83   : > { %p962_p9 = pnand %p961_p2, %p955_p0 }
  0x84   : > { %747 = vmatmul.mubr.msk.bf16.vlgmr.msra.gmra.mrb[0].mxu0 %vm397_vm1, %v366_v10 }
  0xf9   : > { %v462_v11 = vpop.permute.xlu0 %461 }
 0x157   : > { %v442_v12 = vpop.f32.mrb[0].mxu0 }
 0x158   : > { %v464_v13 = vadd.f32 %v462_v11, %v442_v12  ;;  %v444_v14 = vpop.f32.mrb[1].mxu0 }
 0x159   : > { %v465_v15 = vadd.f32 %v462_v11, %v444_v14  ;;  %v446_v16 = vpop.f32.mrb[2].mxu0 }
 0x15a   : > { %466 = vst [vmem:[%s339_s6] sm:$0xff] %v464_v13  ;;  %v447_v17 = vpop.f32.mrb[3].mxu0  ;;  %v473_v18 = vmul.f32 %v464_v13, %v464_v13 }
 0x15b   : > { %467 = vst [vmem:[%s339_s6 + $0x8] sm:$0xff] %v465_v15  ;;  %v468_v19 = vadd.f32 %v465_v15, %v464_v13  ;;  %v474_v20 = vmul.f32 %v465_v15, %v465_v15 }
 0x15d   : > { %469 = vadd.xlane.f32.xlu0 %v468_v19  ;;  %v475_v21 = vadd.f32 %v474_v20, %v473_v18 }
 0x15f   : > { %476 = vadd.xlane.f32.xlu1 %v475_v21 }
 0x160   : > { %965 = shalt.err (!%p962_p9)
}
 0x161   : > { %s966_s10 = scalar_lea.hbm %s1339_s15, 256  ;;  %s970_s6 = scalar_lea.hbm %s1456_s3, 512 }
 0x162   : > { %p967_p13 = scmp.ne.s32.totalorder %s1339_s15, %s966_s10  ;;  %p971_p12 = scmp.lt.u32.totalorder %s1339_s15, %s1456_s3 }
 0x163   : > { %p972_p5 = scmp.lt.u32.totalorder %s970_s6, %s966_s10  ;;  %p974_p10 = scmp.lt.u32.totalorder %s966_s10, %s1339_s15 }
 0x164   : > { %p968_p4 = pnand %p967_p13, %p1479_p11 }
 0x165   : > { %p973_p7 = por %p972_p5, %p971_p12 }
 0x166   : > { %p969_p8 = pneg %p968_p4 }
 0x167   : > { %p975_p1 = por %p974_p10, %p973_p7 }
 0x169   : > { %p976_p0 = pnand %p975_p1, %p969_p8 }
 0x16b   : > { %979 = shalt.err (!%p976_p0)
}
 0x16c   : > { %771 = dma.vmem_to_hbm [thread:$0]  (%p1479_p11), %s509_s7, 256, %s1339_s15, %s480_s8   ;;  %vm471_vm2 = vcmask 7168  }
 0x16d   : > { %s738_s13 = sshll.u32 %s1322_s17, 3  ;;  %s484_s16 = sand.u32 1, %s1170_s24  }
 0x16e   : > { %s753_s1 = sshll.u32 %s1090_s21, 7  ;;  %s346_s12 = scalar_lea.vmem [#allocation10], %s738_s13 }
 0x16f   : > { %s524_s27 = sshll.u32 %s346_s12, 4  ;;  %s1362_s26 = scalar_lea.vmem [#allocation12], %s738_s13  ;;  %s1370_s27 = int_to_ptr.vmem [resolvable:$true] %s524_s27 }
 0x170   : > { %s540_s10 = sshll.u32 %s1362_s26, 4  ;;  %s1368_s9 = scalar_lea.hbm %s1457_s4, %s753_s1  ;;  %s1378_s10 = int_to_ptr.vmem [resolvable:$true] %s540_s10 }
 0x171   : > { %s1376_s17 = scalar_lea.hbm %s1458_s5, %s753_s1  ;;  %s1380_s7 = scalar_lea.sflag [#allocation11], %s484_s16 }
 0x172   : > { %s980_s15 = scalar_lea.vmem %s1370_s27, 128  ;;  %s1107_s8 = smov [#allocation10]  }
 0x173   : > { %p981_p6 = scmp.ne.s32.totalorder %s1370_s27, %s980_s15  ;;  %s984_s25 = sshll.u32 %s1107_s8, 4  ;;  %s985_s25 = int_to_ptr.vmem [resolvable:$false] %s984_s25 }
 0x174   : > { %s986_s13 = scalar_lea.vmem %s985_s25, 256  ;;  %p987_p9 = scmp.lt.s32.totalorder %s1370_s27, %s985_s25 }
 0x175   : > { %p982_p3 = pnand %p981_p6, %p1479_p11  ;;  %p988_p13 = scmp.lt.s32.totalorder %s986_s13, %s980_s15 }
 0x177   : > { %p983_p2 = pneg %p982_p3  ;;  %p989_p4 = por %p988_p13, %p987_p9 }
 0x179   : > { %p990_p8 = pnand %p989_p4, %p983_p2 }
 0x1ea   : > { %v470_v22 = vpop.xlane.xlu0 %469 }
 0x1eb   : > { %472 = vst.msk [vmem:[%s346_s12] sm:$0xff] %vm471_vm2, %v470_v22 }
 0x1ec   : > { %v477_v23 = vpop.xlane.xlu1 %476 }
 0x1ed   : > { %993 = shalt.err (!%p990_p8)
}
 0x1ee   : > { %s994_s16 = scalar_lea.hbm %s1368_s9, 128  ;;  %s998_s28 = scalar_lea.hbm %s1457_s4, 256 }
 0x1ef   : > { %p995_p12 = scmp.ne.s32.totalorder %s1368_s9, %s994_s16  ;;  %p999_p10 = scmp.lt.u32.totalorder %s1368_s9, %s1457_s4 }
 0x1f0   : > { %p1000_p1 = scmp.lt.u32.totalorder %s998_s28, %s994_s16  ;;  %p1002_p6 = scmp.lt.u32.totalorder %s994_s16, %s1368_s9 }
 0x1f1   : > { %p996_p5 = pnand %p995_p12, %p1479_p11 }
 0x1f2   : > { %p1001_p0 = por %p1000_p1, %p999_p10 }
 0x1f3   : > { %p997_p7 = pneg %p996_p5 }
 0x1f4   : > { %p1003_p3 = por %p1002_p6, %p1001_p0 }
 0x1f6   : > { %p1004_p2 = pnand %p1003_p3, %p997_p7 }
 0x1f8   : > { %1007 = shalt.err (!%p1004_p2)
}
 0x1f9   : > { %772 = dma.vmem_to_hbm [thread:$0]  (%p1479_p11), %s1370_s27, 128, %s1368_s9, %s1380_s7   ;;  %478 = vst.msk [vmem:[%s1362_s26] sm:$0xff] %vm471_vm2, %v477_v23 }
 0x1fa   : > { %s1008_s24 = scalar_lea.vmem %s1378_s10, 128  ;;  %s1108_s15 = smov [#allocation12]  }
 0x1fb   : > { %p1009_p9 = scmp.ne.s32.totalorder %s1378_s10, %s1008_s24  ;;  %s1012_s8 = sshll.u32 %s1108_s15, 4  ;;  %s1013_s8 = int_to_ptr.vmem [resolvable:$false] %s1012_s8 }
 0x1fc   : > { %s1014_s25 = scalar_lea.vmem %s1013_s8, 256  ;;  %p1015_p8 = scmp.lt.s32.totalorder %s1378_s10, %s1013_s8 }
 0x1fd   : > { %p1010_p13 = pnand %p1009_p9, %p1479_p11  ;;  %p1016_p12 = scmp.lt.s32.totalorder %s1014_s25, %s1008_s24 }
 0x1ff   : > { %p1011_p4 = pneg %p1010_p13  ;;  %p1017_p5 = por %p1016_p12, %p1015_p8 }
 0x201   : > { %p1018_p7 = pnand %p1017_p5, %p1011_p4 }
 0x203   : > { %1021 = shalt.err (!%p1018_p7)
}
 0x204   : > { %s1022_s27 = scalar_lea.hbm %s1376_s17, 128  ;;  %s1026_s13 = scalar_lea.hbm %s1458_s5, 256 }
 0x205   : > { %p1023_p10 = scmp.ne.s32.totalorder %s1376_s17, %s1022_s27  ;;  %p1027_p6 = scmp.lt.u32.totalorder %s1376_s17, %s1458_s5 }
 0x206   : > { %p1028_p3 = scmp.lt.u32.totalorder %s1026_s13, %s1022_s27  ;;  %p1030_p9 = scmp.lt.u32.totalorder %s1022_s27, %s1376_s17 }
 0x207   : > { %p1024_p1 = pnand %p1023_p10, %p1479_p11 }
 0x208   : > { %p1029_p2 = por %p1028_p3, %p1027_p6 }
 0x209   : > { %p1025_p0 = pneg %p1024_p1 }
 0x20a   : > { %p1031_p13 = por %p1030_p9, %p1029_p2 }
 0x20c   : > { %p1032_p4 = pnand %p1031_p13, %p1025_p0 }
 0x20e   : > { %1035 = shalt.err (!%p1032_p4)
}
 0x20f   : > { %773 = dma.vmem_to_hbm [thread:$0]  (%p1479_p11), %s1378_s10, 128, %s1376_s17, %s1380_s7  }
 0x210 PF: > { %s552_s12 = sand.u32 1, %s1078_s18   ;;  %p1480_p8 = scmp.ne.s32.totalorder %s1469_s30, 0 }
 0x211   : > { %p1481_p12 = scmp.ge.s32.totalorder %s1098_s23, 2  ;;  %s553_s28 = scalar_lea.sflag [#allocation5], %s552_s12 }
 0x213   : > { %p789_p5 = pnand %p1481_p12, %p1480_p8 }
 0x215   : > { %1069 = dma.done.wait (!%p789_p5), %s553_s28, 256  }
 0x216   : > { %1071 = vsyncadd (!%p789_p5), %s553_s28, 4294967040  ;;  %s1482_s6 = sadd.s32 4294967294, %s1098_s23  }
 0x217   : > { %s561_s21 = sand.u32 1, %s1482_s6  }
 0x218   : > { %s562_s24 = scalar_lea.sflag [#allocation11], %s561_s21 }
 0x219   : > { %1073 = dma.done.wait (!%p789_p5), %s562_s24, 256  }
 0x21a   : > { %1075 = vsyncadd (!%p789_p5), %s562_s24, 4294967040  ;;  %s26_s23 = sadd.s32 1, %s1098_s23   ;;  %s1483_s18 = smov %s1082_s19 }
 0x21b   : > { %p23_p11 = scmp.ge.s32.totalorder %s26_s23, 4   ;;  %s1484_s19 = smov %s1086_s20 }
 0x21c   : > { %s1485_s20 = smov %s1289_s11  ;;  %s1486_s21 = smov %s1094_s22 }
 0x21d   : > { %s1487_s22 = smov %s1489_s14  ;;  %25 = sbr.rel (!%p23_p11) target bundleno = 11 (0xb), region = 127 }
 0x224   :  { %576 = vsyncpa [#allocation4], 1 }
 0x225   :  { %578 = vsyncpa [#allocation4 + $0x1], 1 }
 0x226   :  { %579 = vsyncpa [#allocation7], 1 }
 0x227   :  { %580 = vsyncpa [#allocation5], 1 }
 0x228   :  { %582 = vsyncpa [#allocation5 + $0x1], 1 }
 0x229   :  { %583 = vsyncpa [#allocation11], 1 }
 0x22a   :  { %585 = vsyncpa [#allocation11 + $0x1], 1 }

</bundles_post_ra>
